<compile_context>
chip_gen: v7x
topology: tpu7x:2x2x1
jax: 0.10.0
libtpu: 0.0.40
codegen_flags: <defaults>
</compile_context>

<pallas_src>
import functools

import numpy as np
import jax
import jax.numpy as jnp
from jax.experimental import pallas as pl
from jax.experimental.pallas import tpu as pltpu


def _blaze_block_kernel(xf_ref, dww_ref, pwbd_ref, sel_ref, pwb_ref, o_ref, *,
                        ksize, W, HW):
    # xf_ref  : (B*Cin,  HW + 2*PADF)  flat zero-padded activations (B images)
    # dww_ref : (B*Cin,  k*k)          depthwise weights, tiled per image
    # pwbd_ref: (B*Cout, B*Cin)        block-diagonal pointwise weights (transposed)
    # sel_ref : (B*Cout, B*Cin)        block-diagonal 0/1 channel-pad selection
    # pwb_ref : (B*Cout, 1)            pointwise bias (+ folded depthwise bias), f32
    # o_ref   : (B*Cout, HW)
    pad = (ksize - 1) // 2
    padf = pad * W + pad

    xf = xf_ref[...]                     # single hoisted load of the padded block
    dww = dww_ref[...]                   # hoisted out of the unrolled tap loop
    cdt = xf.dtype
    cpack = xf.shape[0]

    # Column index of each flat output position, built in-kernel (no HBM mask
    # stream).  Power-of-two widths reduce to a bitwise AND.
    lane = jax.lax.broadcasted_iota(jnp.int32, (1, HW), 1)
    col = (lane & (W - 1)) if (W & (W - 1)) == 0 else (lane % W)

    # Depthwise k x k conv: unrolled taps over shifted flat windows (VPU).
    # Tap (ky, kx) for flat output position p reads xf[:, p + ky*W + kx].
    acc = jnp.zeros((cpack, HW), cdt)
    center = None
    for kx in range(ksize):
        colacc = jnp.zeros((cpack, HW), cdt)
        for ky in range(ksize):
            j = ky * ksize + kx
            start = ky * W + kx
            win = xf[:, start:start + HW]                 # (Cpack, HW)
            if ky == pad and kx == pad:
                center = win                              # reuse for the residual
            colacc = colacc + win * dww[:, j:j + 1]       # per-channel scalar bcast
        # Zero taps that wrapped across an image-row boundary (NaN/Inf safe).
        lo, hi = pad - kx, W + pad - kx
        conds = []
        if lo > 0:
            conds.append(col >= lo)
        if hi < W:
            conds.append(col < hi)
        if conds:
            valid = conds[0] if len(conds) == 1 else (conds[0] & conds[1])
            colacc = jnp.where(valid, colacc, jnp.zeros_like(colacc))
        acc = acc + colacc

    # Pointwise 1x1 conv (block-diagonal over the B images) on the MXU: lanes
    # carry HW, accumulation in f32.
    y = jnp.dot(pwbd_ref[...], acc, preferred_element_type=jnp.float32)
    # Channel-zero-padded identity skip via a tiny 0/1 matmul -> the epilogue is
    # a single full-tile (B*Cout, HW) store.
    y = y + jnp.dot(sel_ref[...], center, preferred_element_type=jnp.float32)
    y = y + pwb_ref[...]
    o_ref[...] = jnp.maximum(y, 0.0).astype(o_ref.dtype)


def blaze_block(x_nchw, dw_w, dw_b, pw_w, pw_b, *, kernel_size=3, stride=1,
                compute_dtype=jnp.float32, max_block_bytes=4 << 20):
    """BlazeBlock forward (stride=1, relu, zero-padded skip). NCHW in/out, f32 result."""
    assert stride == 1, "only the stride==1 path is implemented"
    assert kernel_size % 2 == 1
    N, Cin, H, W = x_nchw.shape
    Cout = pw_w.shape[1]
    k = kernel_size
    pad = (k - 1) // 2
    HW = H * W
    PADF = pad * W + pad
    HWP = HW + 2 * PADF
    f32 = jnp.float32
    itemsize = jnp.dtype(compute_dtype).itemsize

    # Images per grid step: prefer full 8-row sublane packing of the
    # (B*Cin, HW) depthwise tiles (key for Cin < 8 stem blocks) while keeping
    # the input block under a VMEM budget.  b == N is always a legal fallback
    # (block equals full array dims).
    candidates = [b for b in range(1, N + 1) if N % b == 0 and
                  (((b * Cin) % 8 == 0 and (b * Cout) % 8 == 0) or b == N)]
    within = [b for b in candidates if b * Cin * HWP * itemsize <= max_block_bytes]
    B = max(within) if within else min(candidates)
    Cpack, Rout, G = B * Cin, B * Cout, N // B

    # Flatten spatial dims (layout-preserving) into a 2-D (N*Cin, HW) slab and
    # zero-pad the flat axis so depthwise tap (ky, kx) is the length-HW window
    # starting at ky*W + kx.
    x = x_nchw.astype(f32)
    xflat = jnp.pad(x.reshape(N * Cin, HW), ((0, 0), (PADF, PADF)))
    xflat = xflat.astype(compute_dtype)

    # Weight prep (tiny, one-time XLA ops):
    #   depthwise (k, k, Cin) -> (Cin, k*k), tiled per image in the block
    #   pointwise transposed, block-diagonal over the B images
    #   0/1 channel-pad selection matrix for the residual
    #   depthwise bias folded into the pointwise bias (kept in f32)
    dww1 = jnp.transpose(jnp.reshape(dw_w.astype(f32), (k * k, Cin)))      # (Cin, k*k)
    dww = jnp.tile(dww1, (B, 1)).astype(compute_dtype)                      # (Cpack, k*k)
    pwT = jnp.transpose(pw_w.astype(f32))                                   # (Cout, Cin)
    eyeB = jnp.eye(B, dtype=f32)
    pwbd = jnp.kron(eyeB, pwT).astype(compute_dtype)                        # (Rout, Cpack)
    sel = jnp.kron(eyeB, jnp.eye(Cout, Cin, dtype=f32)).astype(compute_dtype)
    pwb1 = pw_b[0].astype(f32) + dw_b[0].astype(f32) @ pw_w.astype(f32)     # (Cout,)
    pwb = jnp.tile(pwb1, (B,)).reshape(Rout, 1)                             # (Rout, 1) f32

    kernel = functools.partial(_blaze_block_kernel, ksize=k, W=W, HW=HW)

    in_bytes = Cpack * HWP * itemsize
    out_bytes = Rout * HW * 4
    wgt_bytes = (Cpack * k * k + 2 * Rout * Cpack) * itemsize + Rout * 4
    vmem_limit = int(min(64 << 20,
                         max(8 << 20, 2 * (in_bytes + out_bytes) + 4 * wgt_bytes + (1 << 20))))
    cost = pl.CostEstimate(
        flops=int(N * HW * (2 * k * k * Cin + 4 * Cin * Cout + 3 * Cout)),
        transcendentals=0,
        bytes_accessed=int(N * Cin * HWP * itemsize + N * Cout * HW * 4 + G * wgt_bytes),
    )

    out_flat = pl.pallas_call(
        kernel,
        out_shape=jax.ShapeDtypeStruct((N * Cout, HW), jnp.float32),
        grid=(G,),
        in_specs=[
            pl.BlockSpec((Cpack, HWP), lambda i: (i, 0)),
            pl.BlockSpec((Cpack, k * k), lambda i: (0, 0)),
            pl.BlockSpec((Rout, Cpack), lambda i: (0, 0)),
            pl.BlockSpec((Rout, Cpack), lambda i: (0, 0)),
            pl.BlockSpec((Rout, 1), lambda i: (0, 0)),
        ],
        out_specs=pl.BlockSpec((Rout, HW), lambda i: (i, 0)),
        compiler_params=pltpu.CompilerParams(
            dimension_semantics=("parallel",),
            vmem_limit_bytes=vmem_limit),
        cost_estimate=cost,
    )(xflat, dww, pwbd, sel, pwb)

    return out_flat.reshape(N, Cout, H, W)


def _reference_numpy(x, dw_w, dw_b, pw_w, pw_b, ksize=3):
    """Pure-numpy reference mirroring PyTorch BlazeBlock(stride=1) semantics (NCHW)."""
    x = np.asarray(x, np.float32)
    N, Cin, H, W = x.shape
    Cout = np.asarray(pw_w).shape[1]
    pad = (ksize - 1) // 2
    xp = np.pad(x, ((0, 0), (0, 0), (pad, pad), (pad, pad)))
    dww = np.asarray(dw_w, np.float32)             # (k, k, Cin)
    acc = np.zeros((N, Cin, H, W), np.float32)
    for ky in range(ksize):
        for kx in range(ksize):
            acc += xp[:, :, ky:ky + H, kx:kx + W] * dww[ky, kx][None, :, None, None]
    acc += np.asarray(dw_b, np.float32)[0][None, :, None, None]
    y = np.einsum('nchw,cd->ndhw', acc, np.asarray(pw_w, np.float32))
    y += np.asarray(pw_b, np.float32)[0][None, :, None, None]
    skip = np.zeros((N, Cout, H, W), np.float32)
    skip[:, :Cin] = x
    return np.maximum(y + skip, 0.0)


def _run_case(key, N, Cin, Cout, H, W, K, compute_dtype=jnp.float32,
              rtol=1e-5, atol=1e-5, max_block_bytes=4 << 20):
    k0, k1, k2, k3, k4 = jax.random.split(key, 5)
    x = jax.random.normal(k0, (N, Cin, H, W), dtype=jnp.float32)
    dw_w = jax.random.normal(k1, (K, K, Cin), dtype=jnp.float32) * 0.2
    dw_b = jax.random.normal(k2, (1, Cin), dtype=jnp.float32) * 0.1
    pw_w = jax.random.normal(k3, (Cin, Cout), dtype=jnp.float32) * 0.2
    pw_b = jax.random.normal(k4, (1, Cout), dtype=jnp.float32) * 0.1

    out = blaze_block(x, dw_w, dw_b, pw_w, pw_b, kernel_size=K, stride=1,
                      compute_dtype=compute_dtype, max_block_bytes=max_block_bytes)
    out = jax.block_until_ready(out)

    ref = _reference_numpy(np.asarray(x), np.asarray(dw_w), np.asarray(dw_b),
                           np.asarray(pw_w), np.asarray(pw_b), ksize=K)
    assert out.shape == (N, Cout, H, W)
    np.testing.assert_allclose(np.asarray(out, np.float32), ref, rtol=rtol, atol=atol)


if __name__ == "__main__":
    key = jax.random.PRNGKey(0)
    k_a, k_b, k_c, k_d = jax.random.split(key, 4)

    # Channel-expanding stem block (channel_pad > 0): B=2 images per grid step,
    # full 8-row sublane packing of the Cin=4 depthwise tiles.
    _run_case(k_a, N=2, Cin=4, Cout=8, H=16, W=16, K=3)
    # Equal-channel case (channel_pad == 0) exercising the plain-identity skip.
    _run_case(k_b, N=1, Cin=8, Cout=8, H=8, W=8, K=3)
    # Multi-step grid (pipelined) path: VMEM budget forces B=2 -> grid=(2,).
    _run_case(k_c, N=4, Cin=4, Cout=8, H=16, W=16, K=3, max_block_bytes=16_000)
    # bf16 compute path (v6e/v7x lever): f32 MXU accumulation, loose tolerance.
    _run_case(k_d, N=2, Cin=4, Cout=8, H=16, W=16, K=3,
              compute_dtype=jnp.bfloat16, rtol=1e-1, atol=1e-1)

    print("KERNEL_OK")
</pallas_src>

<mosaic_0001>
module attributes {stable_mosaic.version = 11 : i64} {
  func.func @_blaze_block_kernel(%arg0: i32, %arg1: memref<8x290xf32, #tpu.memory_space<vmem>>, %arg2: memref<8x9xf32, #tpu.memory_space<vmem>>, %arg3: memref<16x8xf32, #tpu.memory_space<vmem>>, %arg4: memref<16x8xf32, #tpu.memory_space<vmem>>, %arg5: memref<16x1xf32, #tpu.memory_space<vmem>>, %arg6: memref<16x256xf32, #tpu.memory_space<vmem>>) attributes {dimension_semantics = [#tpu.dimension_semantics<parallel>], iteration_bounds = array<i64: 1>, scalar_prefetch = 0 : i64, scratch_operands = 0 : i64, tpu.core_type = #tpu.core_type<tc>, window_params = [{transform_indices = @transform_0, window_bounds = array<i64: 8, 290>}, {pipeline_mode = #tpu.pipeline_mode<synchronous>, transform_indices = @transform_1, window_bounds = array<i64: 8, 9>}, {pipeline_mode = #tpu.pipeline_mode<synchronous>, transform_indices = @transform_2, window_bounds = array<i64: 16, 8>}, {pipeline_mode = #tpu.pipeline_mode<synchronous>, transform_indices = @transform_3, window_bounds = array<i64: 16, 8>}, {pipeline_mode = #tpu.pipeline_mode<synchronous>, transform_indices = @transform_4, window_bounds = array<i64: 16, 1>}, {transform_indices = @transform_5, window_bounds = array<i64: 16, 256>}]} {
    %c0 = arith.constant 0 : index
    %c0_0 = arith.constant 0 : index
    %0 = vector.load %arg1[%c0, %c0_0] : memref<8x290xf32, #tpu.memory_space<vmem>>, vector<8x290xf32>
    %c0_1 = arith.constant 0 : index
    %c0_2 = arith.constant 0 : index
    %1 = vector.load %arg2[%c0_1, %c0_2] : memref<8x9xf32, #tpu.memory_space<vmem>>, vector<8x9xf32>
    %2 = tpu.iota {dimensions = array<i32: 1>} : vector<1x256xi32>
    %c15_i32 = arith.constant 15 : i32
    %3 = vector.broadcast %c15_i32 : i32 to vector<1x256xi32>
    %4 = arith.andi %2, %3 : vector<1x256xi32>
    %cst = arith.constant 0.000000e+00 : f32
    %5 = vector.broadcast %cst : f32 to vector<8x256xf32>
    %cst_3 = arith.constant 0.000000e+00 : f32
    %6 = vector.broadcast %cst_3 : f32 to vector<8x256xf32>
    %7 = vector.extract_strided_slice %0 {offsets = [0, 0], sizes = [8, 256], strides = [1, 1]} : vector<8x290xf32> to vector<8x256xf32>
    %8 = vector.extract_strided_slice %1 {offsets = [0, 0], sizes = [8, 1], strides = [1, 1]} : vector<8x9xf32> to vector<8x1xf32>
    %9 = vector.broadcast %8 : vector<8x1xf32> to vector<8x256xf32>
    %10 = arith.mulf %7, %9 : vector<8x256xf32>
    %11 = arith.addf %6, %10 : vector<8x256xf32>
    %12 = vector.extract_strided_slice %0 {offsets = [0, 16], sizes = [8, 256], strides = [1, 1]} : vector<8x290xf32> to vector<8x256xf32>
    %13 = vector.extract_strided_slice %1 {offsets = [0, 3], sizes = [8, 1], strides = [1, 1]} : vector<8x9xf32> to vector<8x1xf32>
    %14 = vector.broadcast %13 : vector<8x1xf32> to vector<8x256xf32>
    %15 = arith.mulf %12, %14 : vector<8x256xf32>
    %16 = arith.addf %11, %15 : vector<8x256xf32>
    %17 = vector.extract_strided_slice %0 {offsets = [0, 32], sizes = [8, 256], strides = [1, 1]} : vector<8x290xf32> to vector<8x256xf32>
    %18 = vector.extract_strided_slice %1 {offsets = [0, 6], sizes = [8, 1], strides = [1, 1]} : vector<8x9xf32> to vector<8x1xf32>
    %19 = vector.broadcast %18 : vector<8x1xf32> to vector<8x256xf32>
    %20 = arith.mulf %17, %19 : vector<8x256xf32>
    %21 = arith.addf %16, %20 : vector<8x256xf32>
    %c1_i32 = arith.constant 1 : i32
    %22 = vector.broadcast %c1_i32 : i32 to vector<1x256xi32>
    %23 = arith.cmpi sge, %4, %22 : vector<1x256xi32>
    %cst_4 = arith.constant 0.000000e+00 : f32
    %24 = vector.broadcast %cst_4 : f32 to vector<8x256xf32>
    %25 = vector.shape_cast %23 : vector<1x256xi1> to vector<1x256xi1>
    %26 = vector.broadcast %25 : vector<1x256xi1> to vector<8x256xi1>
    %27 = arith.select %26, %21, %24 : vector<8x256xi1>, vector<8x256xf32>
    %28 = arith.addf %5, %27 : vector<8x256xf32>
    %cst_5 = arith.constant 0.000000e+00 : f32
    %29 = vector.broadcast %cst_5 : f32 to vector<8x256xf32>
    %30 = vector.extract_strided_slice %0 {offsets = [0, 1], sizes = [8, 256], strides = [1, 1]} : vector<8x290xf32> to vector<8x256xf32>
    %31 = vector.extract_strided_slice %1 {offsets = [0, 1], sizes = [8, 1], strides = [1, 1]} : vector<8x9xf32> to vector<8x1xf32>
    %32 = vector.broadcast %31 : vector<8x1xf32> to vector<8x256xf32>
    %33 = arith.mulf %30, %32 : vector<8x256xf32>
    %34 = arith.addf %29, %33 : vector<8x256xf32>
    %35 = vector.extract_strided_slice %0 {offsets = [0, 17], sizes = [8, 256], strides = [1, 1]} : vector<8x290xf32> to vector<8x256xf32>
    %36 = vector.extract_strided_slice %1 {offsets = [0, 4], sizes = [8, 1], strides = [1, 1]} : vector<8x9xf32> to vector<8x1xf32>
    %37 = vector.broadcast %36 : vector<8x1xf32> to vector<8x256xf32>
    %38 = arith.mulf %35, %37 : vector<8x256xf32>
    %39 = arith.addf %34, %38 : vector<8x256xf32>
    %40 = vector.extract_strided_slice %0 {offsets = [0, 33], sizes = [8, 256], strides = [1, 1]} : vector<8x290xf32> to vector<8x256xf32>
    %41 = vector.extract_strided_slice %1 {offsets = [0, 7], sizes = [8, 1], strides = [1, 1]} : vector<8x9xf32> to vector<8x1xf32>
    %42 = vector.broadcast %41 : vector<8x1xf32> to vector<8x256xf32>
    %43 = arith.mulf %40, %42 : vector<8x256xf32>
    %44 = arith.addf %39, %43 : vector<8x256xf32>
    %45 = arith.addf %28, %44 : vector<8x256xf32>
    %cst_6 = arith.constant 0.000000e+00 : f32
    %46 = vector.broadcast %cst_6 : f32 to vector<8x256xf32>
    %47 = vector.extract_strided_slice %0 {offsets = [0, 2], sizes = [8, 256], strides = [1, 1]} : vector<8x290xf32> to vector<8x256xf32>
    %48 = vector.extract_strided_slice %1 {offsets = [0, 2], sizes = [8, 1], strides = [1, 1]} : vector<8x9xf32> to vector<8x1xf32>
    %49 = vector.broadcast %48 : vector<8x1xf32> to vector<8x256xf32>
    %50 = arith.mulf %47, %49 : vector<8x256xf32>
    %51 = arith.addf %46, %50 : vector<8x256xf32>
    %52 = vector.extract_strided_slice %0 {offsets = [0, 18], sizes = [8, 256], strides = [1, 1]} : vector<8x290xf32> to vector<8x256xf32>
    %53 = vector.extract_strided_slice %1 {offsets = [0, 5], sizes = [8, 1], strides = [1, 1]} : vector<8x9xf32> to vector<8x1xf32>
    %54 = vector.broadcast %53 : vector<8x1xf32> to vector<8x256xf32>
    %55 = arith.mulf %52, %54 : vector<8x256xf32>
    %56 = arith.addf %51, %55 : vector<8x256xf32>
    %57 = vector.extract_strided_slice %0 {offsets = [0, 34], sizes = [8, 256], strides = [1, 1]} : vector<8x290xf32> to vector<8x256xf32>
    %58 = vector.extract_strided_slice %1 {offsets = [0, 8], sizes = [8, 1], strides = [1, 1]} : vector<8x9xf32> to vector<8x1xf32>
    %59 = vector.broadcast %58 : vector<8x1xf32> to vector<8x256xf32>
    %60 = arith.mulf %57, %59 : vector<8x256xf32>
    %61 = arith.addf %56, %60 : vector<8x256xf32>
    %c15_i32_7 = arith.constant 15 : i32
    %62 = vector.broadcast %c15_i32_7 : i32 to vector<1x256xi32>
    %63 = arith.cmpi slt, %4, %62 : vector<1x256xi32>
    %cst_8 = arith.constant 0.000000e+00 : f32
    %64 = vector.broadcast %cst_8 : f32 to vector<8x256xf32>
    %65 = vector.shape_cast %63 : vector<1x256xi1> to vector<1x256xi1>
    %66 = vector.broadcast %65 : vector<1x256xi1> to vector<8x256xi1>
    %67 = arith.select %66, %61, %64 : vector<8x256xi1>, vector<8x256xf32>
    %68 = arith.addf %45, %67 : vector<8x256xf32>
    %c0_9 = arith.constant 0 : index
    %c0_10 = arith.constant 0 : index
    %69 = vector.load %arg3[%c0_9, %c0_10] : memref<16x8xf32, #tpu.memory_space<vmem>>, vector<16x8xf32>
    %cst_11 = arith.constant dense<0.000000e+00> : vector<16x256xf32>
    %70 = tpu.matmul %69, %68, %cst_11 {dimension_numbers = #tpu.dot_dimension_numbers<[1], [0], [0], [1], [0, 0, 1, 1], [], []>} : vector<16x8xf32>, vector<8x256xf32>, vector<16x256xf32> -> vector<16x256xf32>
    %c0_12 = arith.constant 0 : index
    %c0_13 = arith.constant 0 : index
    %71 = vector.load %arg4[%c0_12, %c0_13] : memref<16x8xf32, #tpu.memory_space<vmem>>, vector<16x8xf32>
    %cst_14 = arith.constant dense<0.000000e+00> : vector<16x256xf32>
    %72 = tpu.matmul %71, %35, %cst_14 {dimension_numbers = #tpu.dot_dimension_numbers<[1], [0], [0], [1], [0, 0, 1, 1], [], []>} : vector<16x8xf32>, vector<8x256xf32>, vector<16x256xf32> -> vector<16x256xf32>
    %73 = arith.addf %70, %72 : vector<16x256xf32>
    %c0_15 = arith.constant 0 : index
    %c0_16 = arith.constant 0 : index
    %74 = vector.load %arg5[%c0_15, %c0_16] : memref<16x1xf32, #tpu.memory_space<vmem>>, vector<16x1xf32>
    %75 = vector.broadcast %74 : vector<16x1xf32> to vector<16x256xf32>
    %76 = arith.addf %73, %75 : vector<16x256xf32>
    %cst_17 = arith.constant 0.000000e+00 : f32
    %77 = vector.broadcast %cst_17 : f32 to vector<16x256xf32>
    %78 = arith.maximumf %76, %77 : vector<16x256xf32>
    %c0_18 = arith.constant 0 : index
    %c0_19 = arith.constant 0 : index
    %79 = vector.load %arg6[%c0_18, %c0_19] : memref<16x256xf32, #tpu.memory_space<vmem>>, vector<16x256xf32>
    tpu.vector_store %arg6[%c0_18, %c0_19], %78 {strides = array<i32>} : memref<16x256xf32, #tpu.memory_space<vmem>>, vector<16x256xf32>,
    return
  }
  func.func @transform_0(%arg0: i32) -> (i32, i32) {
    %c0_i32 = arith.constant 0 : i32
    %c0_i32_0 = arith.constant 0 : i32
    return %arg0, %c0_i32 : i32, i32
  }
  func.func @transform_1(%arg0: i32) -> (i32, i32) {
    %c0_i32 = arith.constant 0 : i32
    %c0_i32_0 = arith.constant 0 : i32
    %c0_i32_1 = arith.constant 0 : i32
    return %c0_i32, %c0_i32_0 : i32, i32
  }
  func.func @transform_2(%arg0: i32) -> (i32, i32) {
    %c0_i32 = arith.constant 0 : i32
    %c0_i32_0 = arith.constant 0 : i32
    %c0_i32_1 = arith.constant 0 : i32
    return %c0_i32, %c0_i32_0 : i32, i32
  }
  func.func @transform_3(%arg0: i32) -> (i32, i32) {
    %c0_i32 = arith.constant 0 : i32
    %c0_i32_0 = arith.constant 0 : i32
    %c0_i32_1 = arith.constant 0 : i32
    return %c0_i32, %c0_i32_0 : i32, i32
  }
  func.func @transform_4(%arg0: i32) -> (i32, i32) {
    %c0_i32 = arith.constant 0 : i32
    %c0_i32_0 = arith.constant 0 : i32
    %c0_i32_1 = arith.constant 0 : i32
    return %c0_i32, %c0_i32_0 : i32, i32
  }
  func.func @transform_5(%arg0: i32) -> (i32, i32) {
    %c0_i32 = arith.constant 0 : i32
    %c0_i32_0 = arith.constant 0 : i32
    return %arg0, %c0_i32 : i32, i32
  }
}

</mosaic_0001>

<bundles_post_ra>
// kernel: tpu_custom_call.1
= control target key start
LH: loop header
LB: loop body
LE: loop exit
PB: predicated region body
PF: predicated region fallthrough
CT: control target
= control target key end

     0   :  { %v536_v1 = vmov 4   ;;  %v537_v2 = vmov 7   ;;  %s707_s0 = inlined_call_operand.vmem [shape: f32[8,290], index: 0, kind: input, shape index: {}]   ;;  %s708_s1 = inlined_call_operand.vmem [shape: f32[8,9], index: 1, kind: input, shape index: {}]   ;;  %s709_s2 = inlined_call_operand.vmem [shape: f32[16,8], index: 2, kind: input, shape index: {}]   ;;  %s710_s3 = inlined_call_operand.vmem [shape: f32[16,8], index: 3, kind: input, shape index: {}]   ;;  %s711_s4 = inlined_call_operand.vmem [shape: f32[16,1], index: 4, kind: input, shape index: {}]   ;;  %s712_s5 = inlined_call_operand.hbm [shape: f32[16,256], index: 5, kind: output, shape index: {}]  }
   0x1   :  { %v587_v0 = vld [vmem:[%s708_s1] sm:$0xff]  ;;  %502 = vset.pattern.permute.xlu0 %v536_v1  ;;  %504 = vset.pattern.permute.xlu1 %v537_v2 }
   0x2   :  { %106 = vperm.xlu0 %502, %v587_v0   ;;  %130 = vperm.xlu1 %504, %v587_v0  }
   0x3   :  { %10 = vsyncpa [#allocation3], 0  ;;  %v538_v3 = vmov 5   ;;  %v539_v4 = vmov 8   ;;  %v540_v5 = vmov 3   ;;  %v541_v6 = vmov 1  }
   0x4   :  { %v542_v7 = vmov 6   ;;  %v543_v8 = vmov 2   ;;  %v544_v9 = vmov 0   ;;  %v600_v10 = vld [vmem:[%s707_s0 + $0x8] sm:$0xff]  ;;  %v605_v11 = vld [vmem:[%s707_s0 + $0x10] sm:$0xff]  ;;  %v612_v15 = vld [vmem:[%s707_s0] sm:$0xff] }
   0x5   :  { %s545_s25 = smov 112   ;;  %s546_s0 = smov 96   ;;  %vm55_vm0 = vcmask 916480   ;;  %vm78_vm1 = vcmask 785408   ;;  %vm242_vm2 = vcmask 1031168   ;;  %vm162_vm3 = vcmask 1039360  }
   0x6   :  { %503 = vset.pattern.permute.xlu0 %v538_v3  ;;  %505 = vset.pattern.permute.xlu1 %v539_v4  ;;  %s547_s26 = smov 111   ;;  %s548_s27 = smov 127   ;;  %vm264_vm7 = vcmask 908288   ;;  %vm269_vm9 = vcmask 64512  }
   0x7   :  { %180 = vperm.xlu0 %503, %v587_v0   ;;  %204 = vperm.xlu1 %505, %v587_v0   ;;  %s549_s28 = smov 126  }
   0xb   :  { %506 = vset.pattern.permute.xlu1 %v540_v5  ;;  %507 = vset.pattern.permute.xlu0 %v541_v6  ;;  %v550_v5 = vmov 0.0  }
   0xc   :  { %40 = vperm.xlu1 %506, %v587_v0   ;;  %96 = vperm.xlu0 %507, %v587_v0  }
   0xd   :  { %340 = vmatprep.mubr.f32.mxu1 %v550_v5  ;;  %423 = vmatprep.mubr.f32.mxu0 %v550_v5 }
  0x10   :  { %508 = vset.pattern.permute.xlu1 %v542_v7  ;;  %510 = vset.pattern.permute.xlu0 %v544_v9 }
  0x11   :  { %63 = vperm.xlu1 %508, %v587_v0  }
  0x15   :  { %509 = vset.pattern.permute.xlu1 %v543_v8 }
  0x16   :  { %170 = vperm.xlu1 %509, %v587_v0  }
  0x1a   :  { %511 = vset.pattern.permute.xlu1 %v544_v9 }
  0x81   :  { %v107_v12 = vpop.permute.xlu0 %106  ;;  %v131_v18 = vpop.permute.xlu1 %130 }
  0x82   :  { %v110_v13 = vmul.f32 %v107_v12, %v600_v10  ;;  %v111_v14 = vmul.f32 %v107_v12, %v605_v11  ;;  %v109_v16 = vmul.f32 %v107_v12, %v612_v15  ;;  %v134_v21 = vmul.f32 %v131_v18, %v600_v10 }
  0x83   :  { %v135_v22 = vmul.f32 %v131_v18, %v605_v11  ;;  %v133_v26 = vmul.f32 %v131_v18, %v612_v15 }
  0x84   :  { %119 = vrot.lane.b32.xlu1 %v111_v14, %s545_s25  ;;  %117 = vrot.lane.b32.xlu0 %v110_v13, %s545_s25 }
  0x86   :  { %v181_v17 = vpop.permute.xlu0 %180  ;;  %v205_v23 = vpop.permute.xlu1 %204 }
  0x87   :  { %v184_v19 = vmul.f32 %v181_v17, %v600_v10  ;;  %v185_v20 = vmul.f32 %v181_v17, %v605_v11  ;;  %v183_v24 = vmul.f32 %v181_v17, %v612_v15  ;;  %v208_v25 = vmul.f32 %v205_v23, %v600_v10 }
  0x88   :  { %115 = vrot.lane.b32.xlu0 %v109_v16, %s545_s25  ;;  %v209_v27 = vmul.f32 %v205_v23, %v605_v11  ;;  %v207_v28 = vmul.f32 %v205_v23, %v612_v15 }
  0x89   :  { %191 = vrot.lane.b32.xlu1 %v184_v19, %s545_s25  ;;  %v437_v19 = vld [vmem:[%s711_s4 + $0x8] sm:$0xff] }
  0x8b   :  { %v41_v29 = vpop.permute.xlu1 %40  ;;  %v97_v38 = vpop.permute.xlu0 %96 }
  0x8c   :  { %193 = vrot.lane.b32.xlu0 %v185_v20, %s545_s25  ;;  %v44_v30 = vmul.f32 %v41_v29, %v600_v10  ;;  %v45_v31 = vmul.f32 %v41_v29, %v605_v11  ;;  %v43_v33 = vmul.f32 %v41_v29, %v612_v15  ;;  %v101_v44 = vmul.f32 %v97_v38, %v605_v11 }
  0x8d   :  { %141 = vrot.lane.b32.xlu1 %v134_v21, %s546_s0  ;;  %v100_v59 = vmul.f32 %v97_v38, %v600_v10  ;;  %v99_v8 = vmul.f32 %v97_v38, %v612_v15 }
  0x90   :  { %143 = vrot.lane.b32.xlu0 %v135_v22, %s546_s0  ;;  %v64_v32 = vpop.permute.xlu1 %63  ;;  %v436_v22 = vld [vmem:[%s711_s4] sm:$0xff] }
  0x91   :  { %189 = vrot.lane.b32.xlu1 %v183_v24, %s545_s25  ;;  %v67_v34 = vmul.f32 %v64_v32, %v600_v10  ;;  %v68_v35 = vmul.f32 %v64_v32, %v605_v11  ;;  %v66_v36 = vmul.f32 %v64_v32, %v612_v15 }
  0x94   :  { %139 = vrot.lane.b32.xlu0 %v133_v26, %s546_s0 }
  0x95   :  { %215 = vrot.lane.b32.xlu1 %v208_v25, %s546_s0  ;;  %v171_v37 = vpop.permute.xlu1 %170 }
  0x96   :  { %v175_v51 = vmul.f32 %v171_v37, %v605_v11  ;;  %v174_v54 = vmul.f32 %v171_v37, %v600_v10 }
  0x98   :  { %217 = vrot.lane.b32.xlu0 %v209_v27, %s546_s0 }
  0x99   :  { %213 = vrot.lane.b32.xlu1 %v207_v28, %s546_s0 }
  0x9c   :  { %32 = vperm.xlu0 %510, %v587_v0   ;;  %v173_v0 = vmul.f32 %v171_v37, %v612_v15 }
  0x9d   :  { %51 = vrot.lane.b32.xlu1 %v44_v30, %s545_s25 }
  0xa0   :  { %260 = vrot.lane.b32.xlu0 %v600_v10, %s547_s26 }
  0xa1   :  { %53 = vrot.lane.b32.xlu1 %v45_v31, %s545_s25 }
  0xa4   :  { %49 = vrot.lane.b32.xlu0 %v43_v33, %s545_s25 }
  0xa5   :  { %74 = vrot.lane.b32.xlu1 %v67_v34, %s546_s0 }
  0xa8   :  { %76 = vrot.lane.b32.xlu0 %v68_v35, %s546_s0 }
  0xa9   :  { %72 = vrot.lane.b32.xlu1 %v66_v36, %s546_s0  ;;  %v25_v36 = vlaneseq }
  0xab   :  { %v26_v37 = vand.u32 127, %v25_v36 }
  0xf6   :  { %v120_v39 = vpop.permute.xlu1 %119  ;;  %v118_v40 = vpop.permute.xlu0 %117 }
  0xf7   :  { %v128_v46 = vadd.f32 %v120_v39, %v101_v44  ;;  %v122_v56 = vsel %vm55_vm0, %v118_v40, %v120_v39 }
  0xf8   :  { %v127_v3 = vadd.f32 %v122_v56, %v100_v59 }
  0xfa   :  { %v116_v41 = vpop.permute.xlu0 %115 }
  0xfb   :  { %v192_v42 = vpop.permute.xlu1 %191  ;;  %v121_v6 = vsel %vm55_vm0, %v116_v41, %v118_v40  ;;  %v28_v41 = vand.u32 15, %v26_v37 }
  0xfc   :  { %v126_v16 = vadd.f32 %v121_v6, %v99_v8 }
  0xfd   :  { %vm85_vm6 = vcmp.ge.s32.totalorder %v28_v41, 1  ;;  %vm227_vm8 = vcmp.lt.s32.totalorder %v28_v41, 15 }
  0xfe   :  { %v194_v43 = vpop.permute.xlu0 %193 }
  0xff   :  { %v142_v45 = vpop.permute.xlu1 %141  ;;  %v196_v52 = vsel %vm55_vm0, %v192_v42, %v194_v43  ;;  %v202_v55 = vadd.f32 %v194_v43, %v175_v51 }
 0x100   :  { %v201_v57 = vadd.f32 %v196_v52, %v174_v54 }
 0x102   :  { %v144_v47 = vpop.permute.xlu0 %143 }
 0x103   :  { %v152_v48 = vadd.f32 %v144_v47, %v128_v46  ;;  %v190_v49 = vpop.permute.xlu1 %189  ;;  %v146_v1 = vsel %vm78_vm1, %v142_v45, %v144_v47 }
 0x104   :  { %v195_v60 = vsel %vm55_vm0, %v190_v49, %v192_v42  ;;  %v151_v9 = vadd.f32 %v146_v1, %v127_v3 }
 0x105   :  { %160 = vrot.lane.b32.xlu1 %v152_v48, %s548_s27  ;;  %v200_v7 = vadd.f32 %v195_v60, %v173_v0  ;;  %v253_v60 = vld [vmem:[%s710_s3] sm:$0xff]  ;;  %v252_v0 = vld [vmem:[%s709_s2 + $0x8] sm:$0xff] }
 0x106   :  { %v140_v50 = vpop.permute.xlu0 %139 }
 0x107   :  { %v216_v53 = vpop.permute.xlu1 %215  ;;  %v145_v13 = vsel %vm78_vm1, %v140_v50, %v142_v45 }
 0x108   :  { %v150_v17 = vadd.f32 %v145_v13, %v126_v16 }
 0x10a   :  { %v218_v58 = vpop.permute.xlu0 %217 }
 0x10b   :  { %v220_v61 = vsel %vm78_vm1, %v216_v53, %v218_v58  ;;  %v226_v62 = vadd.f32 %v218_v58, %v202_v55  ;;  %v214_v63 = vpop.permute.xlu1 %213 }
 0x10c   :  { %v225_v2 = vadd.f32 %v220_v61, %v201_v57  ;;  %v219_v4 = vsel %vm78_vm1, %v214_v63, %v216_v53  ;;  %v251_v61 = vld [vmem:[%s709_s2] sm:$0xff]  ;;  %v254_v63 = vld [vmem:[%s710_s3 + $0x8] sm:$0xff]  ;;  %s551_s2 = smov [#allocation2]  }
 0x10d   :  { %240 = vrot.lane.b32.xlu0 %v226_v62, %s549_s28  ;;  %v224_v14 = vadd.f32 %v219_v4, %v200_v7  ;;  %s465_s3 = sshll.u32 %s551_s2, 4  ;;  %s466_s3 = int_to_ptr.vmem [resolvable:$true] %s465_s3 }
 0x10e   :  { %238 = vrot.lane.b32.xlu1 %v225_v2, %s549_s28  ;;  %s512_s15 = scalar_lea.vmem %s466_s3, 512  ;;  %p517_p1 = scmp.lt.s32.totalorder %s466_s3, %s466_s3 }
 0x10f   :  { %v52_v12 = vpop.permute.xlu1 %51  ;;  %p513_p0 = scmp.ne.s32.totalorder %s466_s3, %s512_s15  ;;  %p518_p2 = scmp.lt.s32.totalorder %s512_s15, %s512_s15 }
 0x111   :  { %158 = vrot.lane.b32.xlu0 %v151_v9, %s548_s27  ;;  %p519_p3 = por %p518_p2, %p517_p1 }
 0x112   :  { %236 = vrot.lane.b32.xlu1 %v224_v14, %s549_s28 }
 0x113   :  { %v54_v18 = vpop.permute.xlu1 %53  ;;  %p520_p4 = pnand %p519_p3, %p513_p0 }
 0x114   :  { %v57_v26 = vsel %vm55_vm0, %v52_v12, %v54_v18 }
 0x115   :  { %156 = vrot.lane.b32.xlu0 %v150_v17, %s548_s27 }
 0x116   :  { %262 = vrot.lane.b32.xlu1 %v605_v11, %s547_s26 }
 0x117   :  { %v75_v21 = vpop.permute.xlu1 %74 }
 0x119   :  { %258 = vrot.lane.b32.xlu0 %v612_v15, %s547_s26 }
 0x11a   :  { %440 = vperm.xlu1 %511, %v436_v22  }
 0x11b   :  { %v33_v20 = vpop.permute.xlu0 %32  ;;  %v73_v25 = vpop.permute.xlu1 %72 }
 0x11c   :  { %v35_v24 = vmul.f32 %v33_v20, %v612_v15  ;;  %v36_v11 = vmul.f32 %v33_v20, %v600_v10  ;;  %v79_v29 = vsel %vm78_vm1, %v73_v25, %v75_v21  ;;  %v27_v15 = vadd.s32 128, %v26_v37 }
 0x11d   :  { %445 = vperm.xlu0 %510, %v437_v19  }
 0x11e   :  { %v61_v30 = vadd.f32 %v57_v26, %v36_v11  ;;  %v29_v10 = vand.u32 15, %v27_v15 }
 0x11f   :  { %v261_v23 = vpop.permute.xlu0 %260 }
 0x120   :  { %vm86_vm4 = vcmp.ge.s32.totalorder %v29_v10, 1  ;;  %vm228_vm5 = vcmp.lt.s32.totalorder %v29_v10, 15 }
 0x123   :  { %v50_v27 = vpop.permute.xlu0 %49 }
 0x124   :  { %v56_v28 = vsel %vm55_vm0, %v50_v27, %v52_v12 }
 0x125   :  { %v60_v31 = vadd.f32 %v56_v28, %v35_v24 }
 0x127   :  { %v83_v32 = vadd.f32 %v79_v29, %v60_v31  ;;  %v77_v33 = vpop.permute.xlu0 %76 }
 0x128   :  { %v80_v34 = vsel %vm78_vm1, %v75_v21, %v77_v33 }
 0x129   :  { %v84_v35 = vadd.f32 %v80_v34, %v61_v30  ;;  %v91_v52 = vsel %vm85_vm6, %v83_v32, 0.0 }
 0x12b   :  { %v92_v46 = vsel %vm86_vm4, %v84_v35, 0.0 }
 0x177   :  { %v161_v38 = vpop.permute.xlu1 %160 }
 0x17f   :  { %v241_v39 = vpop.permute.xlu0 %240 }
 0x180   :  { %v239_v40 = vpop.permute.xlu1 %238 }
 0x181   :  { %v244_v42 = vsel %vm242_vm2, %v239_v40, %v241_v39 }
 0x182   :  { %v248_v48 = vsel %vm228_vm5, %v244_v42, 0.0 }
 0x183   :  { %v159_v43 = vpop.permute.xlu0 %158 }
 0x184   :  { %v164_v44 = vsel %vm162_vm3, %v159_v43, %v161_v38  ;;  %v237_v45 = vpop.permute.xlu1 %236 }
 0x185   :  { %v168_v47 = vadd.f32 %v164_v44, %v92_v46  ;;  %v243_v49 = vsel %vm242_vm2, %v237_v45, %v239_v40 }
 0x186   :  { %v247_v57 = vsel %vm227_vm8, %v243_v49, 0.0 }
 0x187   :  { %v157_v50 = vpop.permute.xlu0 %156  ;;  %v250_v51 = vadd.f32 %v248_v48, %v168_v47 }
 0x188   :  { %v163_v53 = vsel %vm162_vm3, %v157_v50, %v159_v43  ;;  %v263_v54 = vpop.permute.xlu1 %262 }
 0x189   :  { %v167_v55 = vadd.f32 %v163_v53, %v91_v52  ;;  %359 = vmatprep.subr.mxu0 %v250_v51  ;;  %v266_v56 = vsel %vm264_vm7, %v261_v23, %v263_v54 }
 0x18a   :  { %276 = vmatprep.subr.mxu1 %v266_v56 }
 0x18b   :  { %v259_v58 = vpop.permute.xlu0 %258  ;;  %v249_v59 = vadd.f32 %v247_v57, %v167_v55 }
 0x18c   :  { %v265_v62 = vsel %vm264_vm7, %v259_v58, %v261_v23 }
 0x18d   :  { %277 = vmatpush1.msra.mxu1 %v265_v62  ;;  %360 = vmatpush1.msra.mxu0 %v249_v59 }
 0x18e   :  { %476 = vmatmul.mubr.msk.f32.vlgmr.msra.gmra.mrb[0].mxu1 %vm269_vm9, %v253_v60  ;;  %478 = vmatmul.mubr.msk.f32.vlgmr.msra.gmra.mrb[0].mxu0 %vm269_vm9, %v251_v61 }
 0x18f   :  { %346 = vmatprep.mubr.f32.mxu1 %v550_v5  ;;  %429 = vmatprep.mubr.f32.mxu0 %v550_v5 }
 0x192   :  { %477 = vmatmul.mubr.msk.f32.gmra.mrb[2].mxu1 %vm269_vm9, %v254_v63  ;;  %479 = vmatmul.mubr.msk.f32.gmra.mrb[2].mxu0 %vm269_vm9, %v252_v0 }
 0x199   :  { %v441_v1 = vpop.permute.xlu1 %440 }
 0x19c   :  { %v446_v19 = vpop.permute.xlu0 %445 }
 0x261   :  { %v342_v2 = vpop.f32.mrb[0].mxu1  ;;  %v425_v3 = vpop.f32.mrb[0].mxu0 }
 0x262   :  { %v426_v4 = vadd.f32 %v425_v3, %v342_v2  ;;  %v344_v6 = vpop.f32.mrb[1].mxu1  ;;  %v427_v7 = vpop.f32.mrb[1].mxu0 }
 0x263   :  { %v428_v8 = vadd.f32 %v427_v7, %v344_v6 }
 0x264   :  { %v448_v9 = vadd.f32 %v441_v1, %v426_v4 }
 0x265   :  { %v449_v12 = vadd.f32 %v441_v1, %v428_v8  ;;  %v348_v5 = vpop.f32.mrb[2].mxu1  ;;  %v431_v13 = vpop.f32.mrb[2].mxu0 }
 0x266   :  { %v452_v14 = vmax.f32 %v448_v9, 0.0  ;;  %v432_v16 = vadd.f32 %v431_v13, %v348_v5  ;;  %v350_v17 = vpop.f32.mrb[3].mxu1  ;;  %v433_v18 = vpop.f32.mrb[3].mxu0 }
 0x267   :  { %v453_v20 = vmax.f32 %v449_v12, 0.0  ;;  %v434_v21 = vadd.f32 %v433_v18, %v350_v17 }
 0x268   :  { %456 = vst [vmem:[#allocation2] sm:$0xff] %v452_v14  ;;  %v450_v22 = vadd.f32 %v446_v19, %v432_v16 }
 0x269   :  { %457 = vst [vmem:[#allocation2 + $0x8] sm:$0xff] %v453_v20  ;;  %v451_v23 = vadd.f32 %v446_v19, %v434_v21 }
 0x26a   :  { %v454_v24 = vmax.f32 %v450_v22, 0.0 }
 0x26b   :  { %v455_v11 = vmax.f32 %v451_v23, 0.0 }
 0x26c   :  { %458 = vst [vmem:[#allocation2 + $0x10] sm:$0xff] %v454_v24 }
 0x26d   :  { %459 = vst [vmem:[#allocation2 + $0x18] sm:$0xff] %v455_v11 }
 0x26e   :  { %523 = shalt.err (!%p520_p4)
}
 0x26f   :  { %s524_s18 = scalar_lea.hbm %s712_s5, 512 }
 0x270   :  { %p525_p5 = scmp.ne.s32.totalorder %s712_s5, %s524_s18  ;;  %p528_p6 = scmp.lt.u32.totalorder %s524_s18, %s712_s5 }
 0x272   :  { %p530_p7 = pnand %p528_p6, %p525_p5 }
 0x274   :  { %533 = shalt.err (!%p530_p7)
}
 0x275   :  { %s552_s22 = smov 256   ;;  %s553_s23 = smov 16  }
 0x276   :  { %471 = dma.vmem_to_hbm [thread:$0]  %s466_s3, 512, %s712_s5, [#allocation3], %s552_s22, %s552_s22, %s553_s23  }
 0x277   :  { %534 = dma.done.wait [#allocation3], 512  }
 0x278   :  { %535 = vsyncadd [#allocation3], 4294966784 }
 0x279   :  { %475 = vsyncpa [#allocation3], 1 }

</bundles_post_ra>
